<compile_context>
chip_gen: v5e
topology: v5e:2x2
jax: 0.10.0
libtpu: 0.0.40
codegen_flags: <defaults>
</compile_context>

<pallas_src>
import jax
import jax.numpy as jnp
from jax.experimental import pallas as pl
from jax.experimental.pallas import tpu as pltpu

_EPS = 1e-5


# ----------------------------------------------------------------------------
# Kernels
# ----------------------------------------------------------------------------
def _conv_block_kernel(x_ref, scale_ref, shift_ref, alpha_ref, w_ref,
                       out_ref, stats_ref):
    """[folded BN + PReLU of the previous layer (identity for conv1)]
    -> 3x3 conv (three accumulated block-Toeplitz matmuls, one per dy tap)
    -> per-lane partial BN statistics.  Lane-dense layout (W,C fused).

      x_ref     : (B, H, W*Ci)     raw activations of the previous layer
      scale_ref : (1, W*Ci)        folded BN scale (ones for conv1)
      shift_ref : (1, W*Ci)        folded BN shift (zeros for conv1)
      alpha_ref : (1, W*Ci)        PReLU slope (ones => identity)
      w_ref     : (3, W*Ci, W*Co)  bf16 per-dy block-Toeplitz weights
      out_ref   : (B, H, W*Co)     raw conv output (pre-BN), f32
      stats_ref : (1, 2, W*Co)     per-lane [sum, sum_sq] partials, f32
    """
    B, H, WCi = x_ref.shape
    WCo = out_ref.shape[2]

    # Fused folded-BN scale/shift + PReLU on the incoming activations (f32).
    h = x_ref[...] * scale_ref[...] + shift_ref[...]
    h = jnp.maximum(h, 0.0) + alpha_ref[...] * jnp.minimum(h, 0.0)

    # bf16 MXU operands (f32 accumulation).  One lane-dense LHS with B*H rows
    # shared by all three dy taps.
    hb = h.astype(jnp.bfloat16).reshape(B * H, WCi)

    taps = [
        jnp.dot(hb, w_ref[dy], preferred_element_type=jnp.float32)
        .reshape(B, H, WCo)
        for dy in range(3)
    ]

    # dy = 1 (center): row r of the input feeds output row r.
    out_ref[...] = taps[1]
    # dy = 0: input row r feeds output row r+1 (top padding row is zero).
    out_ref[:, 1:, :] += taps[0][:, :H - 1, :]
    # dy = 2: input row r feeds output row r-1 (bottom padding row is zero).
    out_ref[:, :H - 1, :] += taps[2][:, 1:, :]

    # Per-lane partial statistics for this step (single f32 pass); the tiny
    # lane->channel fold happens in the wrapper, not on the MXU.
    y = out_ref[...].reshape(B * H, WCo)
    colsum = jnp.sum(y, axis=0, keepdims=True)          # (1, W*Co)
    colsq = jnp.sum(y * y, axis=0, keepdims=True)       # (1, W*Co)
    stats_ref[0] = jnp.concatenate([colsum, colsq], axis=0)


def _bn_act_kernel(x_ref, scale_ref, shift_ref, alpha_ref, out_ref):
    """Folded BN (scale/shift) + PReLU, lane-dense, elementwise, f32."""
    h = x_ref[...] * scale_ref[...] + shift_ref[...]
    out_ref[...] = jnp.maximum(h, 0.0) + alpha_ref[...] * jnp.minimum(h, 0.0)


# ----------------------------------------------------------------------------
# Wrapper-side (tiny, one-time) parameter transforms
# ----------------------------------------------------------------------------
def _toeplitz_weights(w_oihw, W):
    """OIHW 3x3 weights -> (3, W*Ci, W*Co) bf16 per-dy block-Toeplitz
    matrices.  dx taps and the W axis are folded into the matrix; columns
    that would read outside [0, W) simply have no entry (zero), so no lane
    padding of the activations is needed (K = W*Ci, not (W+2)*Ci)."""
    Co, Ci, KH, KW = w_oihw.shape
    w = jnp.transpose(w_oihw, (2, 3, 1, 0)).astype(jnp.float32)   # (3,3,Ci,Co)
    # shifts[dx, p, x] = 1 iff p == x + dx - 1  (p = input col, x = output col)
    shifts = jnp.stack([jnp.eye(W, W, k=1 - dx, dtype=jnp.float32)
                        for dx in range(KW)])                     # (3, W, W)
    big = jnp.einsum('yxio,xpw->ypiwo', w, shifts)                # (3,W,Ci,W,Co)
    # NOTE: density ~3/W; switch to im2col (K=9*Ci) once MXU-bound.
    return big.reshape(KH, W * Ci, W * Co).astype(jnp.bfloat16)


def _fold_bn(stats, gamma, beta, count, W, C):
    """Per-step lane-dense [sum, sum_sq] partials -> per-channel training-mode
    BatchNorm scale/shift (biased variance), folded so the consuming kernel
    only does a multiply-add.  Tiny per-channel XLA work, kept in f32."""
    s = jnp.sum(stats, axis=0).reshape(2, W, C).sum(axis=1)       # (2, C)
    mean = s[0] / count
    var = jnp.maximum(s[1] / count - mean * mean, 0.0)
    scale = gamma * jax.lax.rsqrt(var + _EPS)
    shift = beta - mean * scale
    return scale, shift


def _lane_params(scale, shift, alpha, W, C):
    """Per-channel scale/shift/alpha -> lane-dense (1, W*C) rows (lane w*C+c
    gets channel c's value)."""
    scale_rep = jnp.tile(jnp.asarray(scale, jnp.float32).reshape(1, C), (1, W))
    shift_rep = jnp.tile(jnp.asarray(shift, jnp.float32).reshape(1, C), (1, W))
    alpha_rep = jnp.broadcast_to(
        jnp.asarray(alpha, jnp.float32).reshape(1, 1), (1, W * C))
    return scale_rep, shift_rep, alpha_rep


def _batch_per_step(N, H, min_rows=128, max_rows=512):
    """Batch elements folded into one grid step.  Grow the MXU M dimension
    (bpg*H rows per matmul) but stop once a step already has >= min_rows rows
    and there are still >= 2 grid steps (v7x has two TensorCores)."""
    bpg = 1
    for d in range(1, N + 1):
        if N % d:
            continue
        if d > 1 and d * H > max_rows:
            break
        bpg = d
        if d * H >= min_rows and N // d >= 2:
            break
    return bpg


# ----------------------------------------------------------------------------
# pallas_call wrappers
# ----------------------------------------------------------------------------
def _run_conv_block(x_ld, scale, shift, alpha, w_dy, H, W, Ci, Co, bpg):
    """x_ld: (N, H, W*Ci) lane-dense raw activations of the previous layer.
    Applies folded BN + PReLU, then the 3x3 conv.  Returns the raw conv
    output (N, H, W*Co) and per-step lane-dense partials (steps, 2, W*Co)."""
    N = x_ld.shape[0]
    steps = N // bpg
    kin, kout = W * Ci, W * Co
    scale_rep, shift_rep, alpha_rep = _lane_params(scale, shift, alpha, W, Ci)

    return pl.pallas_call(
        _conv_block_kernel,
        out_shape=(jax.ShapeDtypeStruct((N, H, kout), jnp.float32),
                   jax.ShapeDtypeStruct((steps, 2, kout), jnp.float32)),
        grid=(steps,),
        in_specs=[
            pl.BlockSpec((bpg, H, kin), lambda n: (n, 0, 0)),
            pl.BlockSpec((1, kin), lambda n: (0, 0)),
            pl.BlockSpec((1, kin), lambda n: (0, 0)),
            pl.BlockSpec((1, kin), lambda n: (0, 0)),
            pl.BlockSpec((3, kin, kout), lambda n: (0, 0, 0)),
        ],
        out_specs=(
            pl.BlockSpec((bpg, H, kout), lambda n: (n, 0, 0)),
            pl.BlockSpec((1, 2, kout), lambda n: (n, 0, 0)),
        ),
        compiler_params=pltpu.CompilerParams(
            dimension_semantics=("parallel",)),
    )(x_ld, scale_rep, shift_rep, alpha_rep, w_dy)


def _run_bn_act(x_ld, scale, shift, alpha, H, W, C, bpg):
    """Final folded BN + PReLU over lane-dense (N, H, W*C)."""
    N = x_ld.shape[0]
    steps = N // bpg
    k = W * C
    scale_rep, shift_rep, alpha_rep = _lane_params(scale, shift, alpha, W, C)

    return pl.pallas_call(
        _bn_act_kernel,
        out_shape=jax.ShapeDtypeStruct((N, H, k), jnp.float32),
        grid=(steps,),
        in_specs=[
            pl.BlockSpec((bpg, H, k), lambda n: (n, 0, 0)),
            pl.BlockSpec((1, k), lambda n: (0, 0)),
            pl.BlockSpec((1, k), lambda n: (0, 0)),
            pl.BlockSpec((1, k), lambda n: (0, 0)),
        ],
        out_specs=pl.BlockSpec((bpg, H, k), lambda n: (n, 0, 0)),
        compiler_params=pltpu.CompilerParams(
            dimension_semantics=("parallel",)),
    )(x_ld, scale_rep, shift_rep, alpha_rep)


def double_conv(x_nchw, w1_oihw, g1, b1, a1, w2_oihw, g2, b2, a2):
    """DoubleConv forward.  x_nchw: (N, Cin, H, W).  Returns (N, Cout, H, W)."""
    N, Cin, H, W = x_nchw.shape
    Cmid = w1_oihw.shape[0]
    Cout = w2_oihw.shape[0]
    count = N * H * W
    bpg = _batch_per_step(N, H)

    # NCHW -> lane-dense (N, H, W*Cin); the (H,W,C)->(H,W*C) flatten is a free
    # view of contiguous NHWC.  Layout change deliberately left to XLA here
    # (tiny at these shapes) -- see TODO(synk) at the top of the file.
    x_ld = jnp.transpose(x_nchw, (0, 2, 3, 1)).astype(jnp.float32)
    x_ld = x_ld.reshape(N, H, W * Cin)

    w1_dy = _toeplitz_weights(w1_oihw, W)    # (3, W*Cin,  W*Cmid) bf16
    w2_dy = _toeplitz_weights(w2_oihw, W)    # (3, W*Cmid, W*Cout) bf16

    # conv1 (identity pre-transform: scale=1, shift=0, alpha=1 -> PReLU is id)
    h1_raw, stats1 = _run_conv_block(
        x_ld, jnp.ones((Cin,), jnp.float32), jnp.zeros((Cin,), jnp.float32),
        1.0, w1_dy, H, W, Cin, Cmid, bpg)

    # Fold BN1 into per-channel scale/shift (tiny per-channel math in XLA).
    scale1, shift1 = _fold_bn(stats1, g1.astype(jnp.float32),
                              b1.astype(jnp.float32), count, W, Cmid)

    # BN1 + PReLU1 fused into the conv2 kernel.
    h2_raw, stats2 = _run_conv_block(
        h1_raw, scale1, shift1, a1, w2_dy, H, W, Cmid, Cout, bpg)

    scale2, shift2 = _fold_bn(stats2, g2.astype(jnp.float32),
                              b2.astype(jnp.float32), count, W, Cout)

    # BN2 + PReLU2.
    out_ld = _run_bn_act(h2_raw, scale2, shift2, a2, H, W, Cout, bpg)

    out_nhwc = out_ld.reshape(N, H, W, Cout)
    return jnp.transpose(out_nhwc, (0, 3, 1, 2))


# ----------------------------------------------------------------------------
# Pure-JAX reference (PyTorch training-mode forward)
# ----------------------------------------------------------------------------
def _reference(x, w1, g1, b1, a1, w2, g2, b2, a2):
    def block(x, w, g, b, a):
        y = jax.lax.conv_general_dilated(
            x, w, window_strides=(1, 1), padding="SAME",
            dimension_numbers=("NCHW", "OIHW", "NCHW"))
        mean = y.mean(axis=(0, 2, 3), keepdims=True)
        var = ((y - mean) ** 2).mean(axis=(0, 2, 3), keepdims=True)
        y = (y - mean) / jnp.sqrt(var + _EPS)
        y = y * g.reshape(1, -1, 1, 1) + b.reshape(1, -1, 1, 1)
        return jnp.where(y >= 0, y, a * y)
    return block(block(x, w1, g1, b1, a1), w2, g2, b2, a2)


if __name__ == "__main__":
    # Shapes consistent with DoubleConv(in_channels=4, out_channels=8)
    N, Cin, H, W = 2, 4, 16, 16
    Cmid, Cout = 8, 8

    key = jax.random.PRNGKey(0)
    kx, kw1, kw2 = jax.random.split(key, 3)

    x = jax.random.normal(kx, (N, Cin, H, W), jnp.float32)
    w1 = jax.random.normal(kw1, (Cmid, Cin, 3, 3), jnp.float32) * 0.1
    w2 = jax.random.normal(kw2, (Cout, Cmid, 3, 3), jnp.float32) * 0.1
    g1 = jnp.ones((Cmid,), jnp.float32)
    b1 = jnp.zeros((Cmid,), jnp.float32)
    g2 = jnp.ones((Cout,), jnp.float32)
    b2 = jnp.zeros((Cout,), jnp.float32)
    a1 = jnp.float32(0.25)   # nn.PReLU() default init
    a2 = jnp.float32(0.25)

    out = jax.jit(double_conv)(x, w1, g1, b1, a1, w2, g2, b2, a2)
    out = jax.block_until_ready(out)

    ref = _reference(x, w1, g1, b1, a1, w2, g2, b2, a2)
    assert out.shape == (N, Cout, H, W)
    err = jnp.max(jnp.abs(out - ref))
    # Tolerance loosened vs the f32-only version: matmul operands are bf16
    # (f32 accumulation), per the perf review.
    assert jnp.allclose(out, ref, rtol=5e-2, atol=5e-2), f"max abs err = {err}"

    print("KERNEL_OK")
</pallas_src>

<mosaic_0001>
module attributes {stable_mosaic.version = 11 : i64} {
  func.func @_conv_block_kernel(%arg0: i32, %arg1: memref<2x16x64xf32, #tpu.memory_space<vmem>>, %arg2: memref<1x64xf32, #tpu.memory_space<vmem>>, %arg3: memref<1x64xf32, #tpu.memory_space<vmem>>, %arg4: memref<1x64xf32, #tpu.memory_space<vmem>>, %arg5: memref<3x64x128xbf16, #tpu.memory_space<vmem>>, %arg6: memref<2x16x128xf32, #tpu.memory_space<vmem>>, %arg7: memref<1x2x128xf32, #tpu.memory_space<vmem>>) attributes {dimension_semantics = [#tpu.dimension_semantics<parallel>], iteration_bounds = array<i64: 1>, scalar_prefetch = 0 : i64, scratch_operands = 0 : i64, tpu.core_type = #tpu.core_type<tc>, window_params = [{transform_indices = @transform_0, window_bounds = array<i64: 2, 16, 64>}, {pipeline_mode = #tpu.pipeline_mode<synchronous>, transform_indices = @transform_1, window_bounds = array<i64: 1, 64>}, {pipeline_mode = #tpu.pipeline_mode<synchronous>, transform_indices = @transform_2, window_bounds = array<i64: 1, 64>}, {pipeline_mode = #tpu.pipeline_mode<synchronous>, transform_indices = @transform_3, window_bounds = array<i64: 1, 64>}, {pipeline_mode = #tpu.pipeline_mode<synchronous>, transform_indices = @transform_4, window_bounds = array<i64: 3, 64, 128>}, {transform_indices = @transform_5, window_bounds = array<i64: 2, 16, 128>}, {transform_indices = @transform_6, window_bounds = array<i64: 1, 2, 128>}]} {
    %c0 = arith.constant 0 : index
    %c0_0 = arith.constant 0 : index
    %c0_1 = arith.constant 0 : index
    %0 = vector.load %arg1[%c0, %c0_0, %c0_1] : memref<2x16x64xf32, #tpu.memory_space<vmem>>, vector<2x16x64xf32>
    %c0_2 = arith.constant 0 : index
    %c0_3 = arith.constant 0 : index
    %1 = vector.load %arg2[%c0_2, %c0_3] : memref<1x64xf32, #tpu.memory_space<vmem>>, vector<1x64xf32>
    %2 = vector.shape_cast %1 : vector<1x64xf32> to vector<1x1x64xf32>
    %3 = vector.broadcast %2 : vector<1x1x64xf32> to vector<2x16x64xf32>
    %4 = arith.mulf %0, %3 : vector<2x16x64xf32>
    %c0_4 = arith.constant 0 : index
    %c0_5 = arith.constant 0 : index
    %5 = vector.load %arg3[%c0_4, %c0_5] : memref<1x64xf32, #tpu.memory_space<vmem>>, vector<1x64xf32>
    %6 = vector.shape_cast %5 : vector<1x64xf32> to vector<1x1x64xf32>
    %7 = vector.broadcast %6 : vector<1x1x64xf32> to vector<2x16x64xf32>
    %8 = arith.addf %4, %7 : vector<2x16x64xf32>
    %cst = arith.constant 0.000000e+00 : f32
    %9 = vector.broadcast %cst : f32 to vector<2x16x64xf32>
    %10 = arith.maximumf %8, %9 : vector<2x16x64xf32>
    %c0_6 = arith.constant 0 : index
    %c0_7 = arith.constant 0 : index
    %11 = vector.load %arg4[%c0_6, %c0_7] : memref<1x64xf32, #tpu.memory_space<vmem>>, vector<1x64xf32>
    %cst_8 = arith.constant 0.000000e+00 : f32
    %12 = vector.broadcast %cst_8 : f32 to vector<2x16x64xf32>
    %13 = arith.minimumf %8, %12 : vector<2x16x64xf32>
    %14 = vector.shape_cast %11 : vector<1x64xf32> to vector<1x1x64xf32>
    %15 = vector.broadcast %14 : vector<1x1x64xf32> to vector<2x16x64xf32>
    %16 = arith.mulf %15, %13 : vector<2x16x64xf32>
    %17 = arith.addf %10, %16 : vector<2x16x64xf32>
    %18 = arith.truncf %17 : vector<2x16x64xf32> to vector<2x16x64xbf16>
    %19 = vector.shape_cast %18 : vector<2x16x64xbf16> to vector<32x64xbf16>
    %c0_9 = arith.constant 0 : index
    %c0_10 = arith.constant 0 : index
    %c0_11 = arith.constant 0 : index
    %20 = vector.load %arg5[%c0_9, %c0_10, %c0_11] : memref<3x64x128xbf16, #tpu.memory_space<vmem>>, vector<1x64x128xbf16>
    %21 = vector.shape_cast %20 : vector<1x64x128xbf16> to vector<64x128xbf16>
    %cst_12 = arith.constant dense<0.000000e+00> : vector<32x128xf32>
    %22 = tpu.matmul %19, %21, %cst_12 {dimension_numbers = #tpu.dot_dimension_numbers<[1], [0], [0], [1], [0, 0, 1, 1], [], []>} : vector<32x64xbf16>, vector<64x128xbf16>, vector<32x128xf32> -> vector<32x128xf32>
    %23 = vector.shape_cast %22 : vector<32x128xf32> to vector<2x16x128xf32>
    %c1 = arith.constant 1 : index
    %c0_13 = arith.constant 0 : index
    %c0_14 = arith.constant 0 : index
    %24 = vector.load %arg5[%c1, %c0_13, %c0_14] : memref<3x64x128xbf16, #tpu.memory_space<vmem>>, vector<1x64x128xbf16>
    %25 = vector.shape_cast %24 : vector<1x64x128xbf16> to vector<64x128xbf16>
    %cst_15 = arith.constant dense<0.000000e+00> : vector<32x128xf32>
    %26 = tpu.matmul %19, %25, %cst_15 {dimension_numbers = #tpu.dot_dimension_numbers<[1], [0], [0], [1], [0, 0, 1, 1], [], []>} : vector<32x64xbf16>, vector<64x128xbf16>, vector<32x128xf32> -> vector<32x128xf32>
    %27 = vector.shape_cast %26 : vector<32x128xf32> to vector<2x16x128xf32>
    %c2 = arith.constant 2 : index
    %c0_16 = arith.constant 0 : index
    %c0_17 = arith.constant 0 : index
    %28 = vector.load %arg5[%c2, %c0_16, %c0_17] : memref<3x64x128xbf16, #tpu.memory_space<vmem>>, vector<1x64x128xbf16>
    %29 = vector.shape_cast %28 : vector<1x64x128xbf16> to vector<64x128xbf16>
    %cst_18 = arith.constant dense<0.000000e+00> : vector<32x128xf32>
    %30 = tpu.matmul %19, %29, %cst_18 {dimension_numbers = #tpu.dot_dimension_numbers<[1], [0], [0], [1], [0, 0, 1, 1], [], []>} : vector<32x64xbf16>, vector<64x128xbf16>, vector<32x128xf32> -> vector<32x128xf32>
    %31 = vector.shape_cast %30 : vector<32x128xf32> to vector<2x16x128xf32>
    %c0_19 = arith.constant 0 : index
    %c0_20 = arith.constant 0 : index
    %c0_21 = arith.constant 0 : index
    %32 = vector.load %arg6[%c0_19, %c0_20, %c0_21] : memref<2x16x128xf32, #tpu.memory_space<vmem>>, vector<2x16x128xf32>
    tpu.vector_store %arg6[%c0_19, %c0_20, %c0_21], %27 {strides = array<i32>} : memref<2x16x128xf32, #tpu.memory_space<vmem>>, vector<2x16x128xf32>,
    %c0_22 = arith.constant 0 : index
    %c1_23 = arith.constant 1 : index
    %c0_24 = arith.constant 0 : index
    %33 = vector.load %arg6[%c0_22, %c1_23, %c0_24] : memref<2x16x128xf32, #tpu.memory_space<vmem>>, vector<2x15x128xf32>
    %34 = vector.extract_strided_slice %23 {offsets = [0, 0, 0], sizes = [2, 15, 128], strides = [1, 1, 1]} : vector<2x16x128xf32> to vector<2x15x128xf32>
    %35 = arith.addf %33, %34 : vector<2x15x128xf32>
    %c0_25 = arith.constant 0 : index
    %c1_26 = arith.constant 1 : index
    %c0_27 = arith.constant 0 : index
    %36 = vector.load %arg6[%c0_25, %c1_26, %c0_27] : memref<2x16x128xf32, #tpu.memory_space<vmem>>, vector<2x15x128xf32>
    tpu.vector_store %arg6[%c0_25, %c1_26, %c0_27], %35 {strides = array<i32>} : memref<2x16x128xf32, #tpu.memory_space<vmem>>, vector<2x15x128xf32>,
    %c0_28 = arith.constant 0 : index
    %c0_29 = arith.constant 0 : index
    %c0_30 = arith.constant 0 : index
    %37 = vector.load %arg6[%c0_28, %c0_29, %c0_30] : memref<2x16x128xf32, #tpu.memory_space<vmem>>, vector<2x15x128xf32>
    %38 = vector.extract_strided_slice %31 {offsets = [0, 1, 0], sizes = [2, 15, 128], strides = [1, 1, 1]} : vector<2x16x128xf32> to vector<2x15x128xf32>
    %39 = arith.addf %37, %38 : vector<2x15x128xf32>
    %c0_31 = arith.constant 0 : index
    %c0_32 = arith.constant 0 : index
    %c0_33 = arith.constant 0 : index
    %40 = vector.load %arg6[%c0_31, %c0_32, %c0_33] : memref<2x16x128xf32, #tpu.memory_space<vmem>>, vector<2x15x128xf32>
    tpu.vector_store %arg6[%c0_31, %c0_32, %c0_33], %39 {strides = array<i32>} : memref<2x16x128xf32, #tpu.memory_space<vmem>>, vector<2x15x128xf32>,
    %c0_34 = arith.constant 0 : index
    %c0_35 = arith.constant 0 : index
    %c0_36 = arith.constant 0 : index
    %41 = vector.load %arg6[%c0_34, %c0_35, %c0_36] : memref<2x16x128xf32, #tpu.memory_space<vmem>>, vector<2x16x128xf32>
    %42 = vector.shape_cast %41 : vector<2x16x128xf32> to vector<32x128xf32>
    %cst_37 = arith.constant dense<0.000000e+00> : vector<128xf32>
    %43 = vector.multi_reduction <add>, %42, %cst_37 [0] : vector<32x128xf32> to vector<128xf32>
    %44 = vector.shape_cast %43 : vector<128xf32> to vector<1x128xf32>
    %45 = arith.mulf %42, %42 : vector<32x128xf32>
    %cst_38 = arith.constant dense<0.000000e+00> : vector<128xf32>
    %46 = vector.multi_reduction <add>, %45, %cst_38 [0] : vector<32x128xf32> to vector<128xf32>
    %47 = vector.shape_cast %46 : vector<128xf32> to vector<1x128xf32>
    %48 = tpu.concatenate %44, %47 in 0 : vector<1x128xf32>, vector<1x128xf32> -> vector<2x128xf32>
    %c0_39 = arith.constant 0 : index
    %c0_40 = arith.constant 0 : index
    %c0_41 = arith.constant 0 : index
    %49 = vector.load %arg7[%c0_39, %c0_40, %c0_41] : memref<1x2x128xf32, #tpu.memory_space<vmem>>, vector<1x2x128xf32>
    %50 = vector.shape_cast %49 : vector<1x2x128xf32> to vector<2x128xf32>
    %51 = vector.shape_cast %48 : vector<2x128xf32> to vector<1x2x128xf32>
    tpu.vector_store %arg7[%c0_39, %c0_40, %c0_41], %51 {strides = array<i32>} : memref<1x2x128xf32, #tpu.memory_space<vmem>>, vector<1x2x128xf32>,
    return
  }
  func.func @transform_0(%arg0: i32) -> (i32, i32, i32) {
    %c0_i32 = arith.constant 0 : i32
    %c0_i32_0 = arith.constant 0 : i32
    %c0_i32_1 = arith.constant 0 : i32
    return %arg0, %c0_i32, %c0_i32_0 : i32, i32, i32
  }
  func.func @transform_1(%arg0: i32) -> (i32, i32) {
    %c0_i32 = arith.constant 0 : i32
    %c0_i32_0 = arith.constant 0 : i32
    %c0_i32_1 = arith.constant 0 : i32
    return %c0_i32, %c0_i32_0 : i32, i32
  }
  func.func @transform_2(%arg0: i32) -> (i32, i32) {
    %c0_i32 = arith.constant 0 : i32
    %c0_i32_0 = arith.constant 0 : i32
    %c0_i32_1 = arith.constant 0 : i32
    return %c0_i32, %c0_i32_0 : i32, i32
  }
  func.func @transform_3(%arg0: i32) -> (i32, i32) {
    %c0_i32 = arith.constant 0 : i32
    %c0_i32_0 = arith.constant 0 : i32
    %c0_i32_1 = arith.constant 0 : i32
    return %c0_i32, %c0_i32_0 : i32, i32
  }
  func.func @transform_4(%arg0: i32) -> (i32, i32, i32) {
    %c0_i32 = arith.constant 0 : i32
    %c0_i32_0 = arith.constant 0 : i32
    %c0_i32_1 = arith.constant 0 : i32
    %c0_i32_2 = arith.constant 0 : i32
    return %c0_i32, %c0_i32_0, %c0_i32_1 : i32, i32, i32
  }
  func.func @transform_5(%arg0: i32) -> (i32, i32, i32) {
    %c0_i32 = arith.constant 0 : i32
    %c0_i32_0 = arith.constant 0 : i32
    %c0_i32_1 = arith.constant 0 : i32
    return %arg0, %c0_i32, %c0_i32_0 : i32, i32, i32
  }
  func.func @transform_6(%arg0: i32) -> (i32, i32, i32) {
    %c0_i32 = arith.constant 0 : i32
    %c0_i32_0 = arith.constant 0 : i32
    %c0_i32_1 = arith.constant 0 : i32
    return %arg0, %c0_i32, %c0_i32_0 : i32, i32, i32
  }
}

module attributes {stable_mosaic.version = 11 : i64} {
  func.func @_conv_block_kernel(%arg0: i32, %arg1: memref<2x16x128xf32, #tpu.memory_space<vmem>>, %arg2: memref<1x128xf32, #tpu.memory_space<vmem>>, %arg3: memref<1x128xf32, #tpu.memory_space<vmem>>, %arg4: memref<1x128xf32, #tpu.memory_space<vmem>>, %arg5: memref<3x128x128xbf16, #tpu.memory_space<vmem>>, %arg6: memref<2x16x128xf32, #tpu.memory_space<vmem>>, %arg7: memref<1x2x128xf32, #tpu.memory_space<vmem>>) attributes {dimension_semantics = [#tpu.dimension_semantics<parallel>], iteration_bounds = array<i64: 1>, scalar_prefetch = 0 : i64, scratch_operands = 0 : i64, tpu.core_type = #tpu.core_type<tc>, window_params = [{transform_indices = @transform_0, window_bounds = array<i64: 2, 16, 128>}, {pipeline_mode = #tpu.pipeline_mode<synchronous>, transform_indices = @transform_1, window_bounds = array<i64: 1, 128>}, {pipeline_mode = #tpu.pipeline_mode<synchronous>, transform_indices = @transform_2, window_bounds = array<i64: 1, 128>}, {pipeline_mode = #tpu.pipeline_mode<synchronous>, transform_indices = @transform_3, window_bounds = array<i64: 1, 128>}, {pipeline_mode = #tpu.pipeline_mode<synchronous>, transform_indices = @transform_4, window_bounds = array<i64: 3, 128, 128>}, {transform_indices = @transform_5, window_bounds = array<i64: 2, 16, 128>}, {transform_indices = @transform_6, window_bounds = array<i64: 1, 2, 128>}]} {
    %c0 = arith.constant 0 : index
    %c0_0 = arith.constant 0 : index
    %c0_1 = arith.constant 0 : index
    %0 = vector.load %arg1[%c0, %c0_0, %c0_1] : memref<2x16x128xf32, #tpu.memory_space<vmem>>, vector<2x16x128xf32>
    %c0_2 = arith.constant 0 : index
    %c0_3 = arith.constant 0 : index
    %1 = vector.load %arg2[%c0_2, %c0_3] : memref<1x128xf32, #tpu.memory_space<vmem>>, vector<1x128xf32>
    %2 = vector.shape_cast %1 : vector<1x128xf32> to vector<1x1x128xf32>
    %3 = vector.broadcast %2 : vector<1x1x128xf32> to vector<2x16x128xf32>
    %4 = arith.mulf %0, %3 : vector<2x16x128xf32>
    %c0_4 = arith.constant 0 : index
    %c0_5 = arith.constant 0 : index
    %5 = vector.load %arg3[%c0_4, %c0_5] : memref<1x128xf32, #tpu.memory_space<vmem>>, vector<1x128xf32>
    %6 = vector.shape_cast %5 : vector<1x128xf32> to vector<1x1x128xf32>
    %7 = vector.broadcast %6 : vector<1x1x128xf32> to vector<2x16x128xf32>
    %8 = arith.addf %4, %7 : vector<2x16x128xf32>
    %cst = arith.constant 0.000000e+00 : f32
    %9 = vector.broadcast %cst : f32 to vector<2x16x128xf32>
    %10 = arith.maximumf %8, %9 : vector<2x16x128xf32>
    %c0_6 = arith.constant 0 : index
    %c0_7 = arith.constant 0 : index
    %11 = vector.load %arg4[%c0_6, %c0_7] : memref<1x128xf32, #tpu.memory_space<vmem>>, vector<1x128xf32>
    %cst_8 = arith.constant 0.000000e+00 : f32
    %12 = vector.broadcast %cst_8 : f32 to vector<2x16x128xf32>
    %13 = arith.minimumf %8, %12 : vector<2x16x128xf32>
    %14 = vector.shape_cast %11 : vector<1x128xf32> to vector<1x1x128xf32>
    %15 = vector.broadcast %14 : vector<1x1x128xf32> to vector<2x16x128xf32>
    %16 = arith.mulf %15, %13 : vector<2x16x128xf32>
    %17 = arith.addf %10, %16 : vector<2x16x128xf32>
    %18 = arith.truncf %17 : vector<2x16x128xf32> to vector<2x16x128xbf16>
    %19 = vector.shape_cast %18 : vector<2x16x128xbf16> to vector<32x128xbf16>
    %c0_9 = arith.constant 0 : index
    %c0_10 = arith.constant 0 : index
    %c0_11 = arith.constant 0 : index
    %20 = vector.load %arg5[%c0_9, %c0_10, %c0_11] : memref<3x128x128xbf16, #tpu.memory_space<vmem>>, vector<1x128x128xbf16>
    %21 = vector.shape_cast %20 : vector<1x128x128xbf16> to vector<128x128xbf16>
    %cst_12 = arith.constant dense<0.000000e+00> : vector<32x128xf32>
    %22 = tpu.matmul %19, %21, %cst_12 {dimension_numbers = #tpu.dot_dimension_numbers<[1], [0], [0], [1], [0, 0, 1, 1], [], []>} : vector<32x128xbf16>, vector<128x128xbf16>, vector<32x128xf32> -> vector<32x128xf32>
    %23 = vector.shape_cast %22 : vector<32x128xf32> to vector<2x16x128xf32>
    %c1 = arith.constant 1 : index
    %c0_13 = arith.constant 0 : index
    %c0_14 = arith.constant 0 : index
    %24 = vector.load %arg5[%c1, %c0_13, %c0_14] : memref<3x128x128xbf16, #tpu.memory_space<vmem>>, vector<1x128x128xbf16>
    %25 = vector.shape_cast %24 : vector<1x128x128xbf16> to vector<128x128xbf16>
    %cst_15 = arith.constant dense<0.000000e+00> : vector<32x128xf32>
    %26 = tpu.matmul %19, %25, %cst_15 {dimension_numbers = #tpu.dot_dimension_numbers<[1], [0], [0], [1], [0, 0, 1, 1], [], []>} : vector<32x128xbf16>, vector<128x128xbf16>, vector<32x128xf32> -> vector<32x128xf32>
    %27 = vector.shape_cast %26 : vector<32x128xf32> to vector<2x16x128xf32>
    %c2 = arith.constant 2 : index
    %c0_16 = arith.constant 0 : index
    %c0_17 = arith.constant 0 : index
    %28 = vector.load %arg5[%c2, %c0_16, %c0_17] : memref<3x128x128xbf16, #tpu.memory_space<vmem>>, vector<1x128x128xbf16>
    %29 = vector.shape_cast %28 : vector<1x128x128xbf16> to vector<128x128xbf16>
    %cst_18 = arith.constant dense<0.000000e+00> : vector<32x128xf32>
    %30 = tpu.matmul %19, %29, %cst_18 {dimension_numbers = #tpu.dot_dimension_numbers<[1], [0], [0], [1], [0, 0, 1, 1], [], []>} : vector<32x128xbf16>, vector<128x128xbf16>, vector<32x128xf32> -> vector<32x128xf32>
    %31 = vector.shape_cast %30 : vector<32x128xf32> to vector<2x16x128xf32>
    %c0_19 = arith.constant 0 : index
    %c0_20 = arith.constant 0 : index
    %c0_21 = arith.constant 0 : index
    %32 = vector.load %arg6[%c0_19, %c0_20, %c0_21] : memref<2x16x128xf32, #tpu.memory_space<vmem>>, vector<2x16x128xf32>
    tpu.vector_store %arg6[%c0_19, %c0_20, %c0_21], %27 {strides = array<i32>} : memref<2x16x128xf32, #tpu.memory_space<vmem>>, vector<2x16x128xf32>,
    %c0_22 = arith.constant 0 : index
    %c1_23 = arith.constant 1 : index
    %c0_24 = arith.constant 0 : index
    %33 = vector.load %arg6[%c0_22, %c1_23, %c0_24] : memref<2x16x128xf32, #tpu.memory_space<vmem>>, vector<2x15x128xf32>
    %34 = vector.extract_strided_slice %23 {offsets = [0, 0, 0], sizes = [2, 15, 128], strides = [1, 1, 1]} : vector<2x16x128xf32> to vector<2x15x128xf32>
    %35 = arith.addf %33, %34 : vector<2x15x128xf32>
    %c0_25 = arith.constant 0 : index
    %c1_26 = arith.constant 1 : index
    %c0_27 = arith.constant 0 : index
    %36 = vector.load %arg6[%c0_25, %c1_26, %c0_27] : memref<2x16x128xf32, #tpu.memory_space<vmem>>, vector<2x15x128xf32>
    tpu.vector_store %arg6[%c0_25, %c1_26, %c0_27], %35 {strides = array<i32>} : memref<2x16x128xf32, #tpu.memory_space<vmem>>, vector<2x15x128xf32>,
    %c0_28 = arith.constant 0 : index
    %c0_29 = arith.constant 0 : index
    %c0_30 = arith.constant 0 : index
    %37 = vector.load %arg6[%c0_28, %c0_29, %c0_30] : memref<2x16x128xf32, #tpu.memory_space<vmem>>, vector<2x15x128xf32>
    %38 = vector.extract_strided_slice %31 {offsets = [0, 1, 0], sizes = [2, 15, 128], strides = [1, 1, 1]} : vector<2x16x128xf32> to vector<2x15x128xf32>
    %39 = arith.addf %37, %38 : vector<2x15x128xf32>
    %c0_31 = arith.constant 0 : index
    %c0_32 = arith.constant 0 : index
    %c0_33 = arith.constant 0 : index
    %40 = vector.load %arg6[%c0_31, %c0_32, %c0_33] : memref<2x16x128xf32, #tpu.memory_space<vmem>>, vector<2x15x128xf32>
    tpu.vector_store %arg6[%c0_31, %c0_32, %c0_33], %39 {strides = array<i32>} : memref<2x16x128xf32, #tpu.memory_space<vmem>>, vector<2x15x128xf32>,
    %c0_34 = arith.constant 0 : index
    %c0_35 = arith.constant 0 : index
    %c0_36 = arith.constant 0 : index
    %41 = vector.load %arg6[%c0_34, %c0_35, %c0_36] : memref<2x16x128xf32, #tpu.memory_space<vmem>>, vector<2x16x128xf32>
    %42 = vector.shape_cast %41 : vector<2x16x128xf32> to vector<32x128xf32>
    %cst_37 = arith.constant dense<0.000000e+00> : vector<128xf32>
    %43 = vector.multi_reduction <add>, %42, %cst_37 [0] : vector<32x128xf32> to vector<128xf32>
    %44 = vector.shape_cast %43 : vector<128xf32> to vector<1x128xf32>
    %45 = arith.mulf %42, %42 : vector<32x128xf32>
    %cst_38 = arith.constant dense<0.000000e+00> : vector<128xf32>
    %46 = vector.multi_reduction <add>, %45, %cst_38 [0] : vector<32x128xf32> to vector<128xf32>
    %47 = vector.shape_cast %46 : vector<128xf32> to vector<1x128xf32>
    %48 = tpu.concatenate %44, %47 in 0 : vector<1x128xf32>, vector<1x128xf32> -> vector<2x128xf32>
    %c0_39 = arith.constant 0 : index
    %c0_40 = arith.constant 0 : index
    %c0_41 = arith.constant 0 : index
    %49 = vector.load %arg7[%c0_39, %c0_40, %c0_41] : memref<1x2x128xf32, #tpu.memory_space<vmem>>, vector<1x2x128xf32>
    %50 = vector.shape_cast %49 : vector<1x2x128xf32> to vector<2x128xf32>
    %51 = vector.shape_cast %48 : vector<2x128xf32> to vector<1x2x128xf32>
    tpu.vector_store %arg7[%c0_39, %c0_40, %c0_41], %51 {strides = array<i32>} : memref<1x2x128xf32, #tpu.memory_space<vmem>>, vector<1x2x128xf32>,
    return
  }
  func.func @transform_0(%arg0: i32) -> (i32, i32, i32) {
    %c0_i32 = arith.constant 0 : i32
    %c0_i32_0 = arith.constant 0 : i32
    %c0_i32_1 = arith.constant 0 : i32
    return %arg0, %c0_i32, %c0_i32_0 : i32, i32, i32
  }
  func.func @transform_1(%arg0: i32) -> (i32, i32) {
    %c0_i32 = arith.constant 0 : i32
    %c0_i32_0 = arith.constant 0 : i32
    %c0_i32_1 = arith.constant 0 : i32
    return %c0_i32, %c0_i32_0 : i32, i32
  }
  func.func @transform_2(%arg0: i32) -> (i32, i32) {
    %c0_i32 = arith.constant 0 : i32
    %c0_i32_0 = arith.constant 0 : i32
    %c0_i32_1 = arith.constant 0 : i32
    return %c0_i32, %c0_i32_0 : i32, i32
  }
  func.func @transform_3(%arg0: i32) -> (i32, i32) {
    %c0_i32 = arith.constant 0 : i32
    %c0_i32_0 = arith.constant 0 : i32
    %c0_i32_1 = arith.constant 0 : i32
    return %c0_i32, %c0_i32_0 : i32, i32
  }
  func.func @transform_4(%arg0: i32) -> (i32, i32, i32) {
    %c0_i32 = arith.constant 0 : i32
    %c0_i32_0 = arith.constant 0 : i32
    %c0_i32_1 = arith.constant 0 : i32
    %c0_i32_2 = arith.constant 0 : i32
    return %c0_i32, %c0_i32_0, %c0_i32_1 : i32, i32, i32
  }
  func.func @transform_5(%arg0: i32) -> (i32, i32, i32) {
    %c0_i32 = arith.constant 0 : i32
    %c0_i32_0 = arith.constant 0 : i32
    %c0_i32_1 = arith.constant 0 : i32
    return %arg0, %c0_i32, %c0_i32_0 : i32, i32, i32
  }
  func.func @transform_6(%arg0: i32) -> (i32, i32, i32) {
    %c0_i32 = arith.constant 0 : i32
    %c0_i32_0 = arith.constant 0 : i32
    %c0_i32_1 = arith.constant 0 : i32
    return %arg0, %c0_i32, %c0_i32_0 : i32, i32, i32
  }
}

module attributes {stable_mosaic.version = 11 : i64} {
  func.func @_bn_act_kernel(%arg0: i32, %arg1: memref<2x16x128xf32, #tpu.memory_space<vmem>>, %arg2: memref<1x128xf32, #tpu.memory_space<vmem>>, %arg3: memref<1x128xf32, #tpu.memory_space<vmem>>, %arg4: memref<1x128xf32, #tpu.memory_space<vmem>>, %arg5: memref<2x16x128xf32, #tpu.memory_space<vmem>>) attributes {dimension_semantics = [#tpu.dimension_semantics<parallel>], iteration_bounds = array<i64: 1>, scalar_prefetch = 0 : i64, scratch_operands = 0 : i64, tpu.core_type = #tpu.core_type<tc>, window_params = [{transform_indices = @transform_0, window_bounds = array<i64: 2, 16, 128>}, {pipeline_mode = #tpu.pipeline_mode<synchronous>, transform_indices = @transform_1, window_bounds = array<i64: 1, 128>}, {pipeline_mode = #tpu.pipeline_mode<synchronous>, transform_indices = @transform_2, window_bounds = array<i64: 1, 128>}, {pipeline_mode = #tpu.pipeline_mode<synchronous>, transform_indices = @transform_3, window_bounds = array<i64: 1, 128>}, {transform_indices = @transform_4, window_bounds = array<i64: 2, 16, 128>}]} {
    %c0 = arith.constant 0 : index
    %c0_0 = arith.constant 0 : index
    %c0_1 = arith.constant 0 : index
    %0 = vector.load %arg1[%c0, %c0_0, %c0_1] : memref<2x16x128xf32, #tpu.memory_space<vmem>>, vector<2x16x128xf32>
    %c0_2 = arith.constant 0 : index
    %c0_3 = arith.constant 0 : index
    %1 = vector.load %arg2[%c0_2, %c0_3] : memref<1x128xf32, #tpu.memory_space<vmem>>, vector<1x128xf32>
    %2 = vector.shape_cast %1 : vector<1x128xf32> to vector<1x1x128xf32>
    %3 = vector.broadcast %2 : vector<1x1x128xf32> to vector<2x16x128xf32>
    %4 = arith.mulf %0, %3 : vector<2x16x128xf32>
    %c0_4 = arith.constant 0 : index
    %c0_5 = arith.constant 0 : index
    %5 = vector.load %arg3[%c0_4, %c0_5] : memref<1x128xf32, #tpu.memory_space<vmem>>, vector<1x128xf32>
    %6 = vector.shape_cast %5 : vector<1x128xf32> to vector<1x1x128xf32>
    %7 = vector.broadcast %6 : vector<1x1x128xf32> to vector<2x16x128xf32>
    %8 = arith.addf %4, %7 : vector<2x16x128xf32>
    %cst = arith.constant 0.000000e+00 : f32
    %9 = vector.broadcast %cst : f32 to vector<2x16x128xf32>
    %10 = arith.maximumf %8, %9 : vector<2x16x128xf32>
    %c0_6 = arith.constant 0 : index
    %c0_7 = arith.constant 0 : index
    %11 = vector.load %arg4[%c0_6, %c0_7] : memref<1x128xf32, #tpu.memory_space<vmem>>, vector<1x128xf32>
    %cst_8 = arith.constant 0.000000e+00 : f32
    %12 = vector.broadcast %cst_8 : f32 to vector<2x16x128xf32>
    %13 = arith.minimumf %8, %12 : vector<2x16x128xf32>
    %14 = vector.shape_cast %11 : vector<1x128xf32> to vector<1x1x128xf32>
    %15 = vector.broadcast %14 : vector<1x1x128xf32> to vector<2x16x128xf32>
    %16 = arith.mulf %15, %13 : vector<2x16x128xf32>
    %17 = arith.addf %10, %16 : vector<2x16x128xf32>
    %c0_9 = arith.constant 0 : index
    %c0_10 = arith.constant 0 : index
    %c0_11 = arith.constant 0 : index
    %18 = vector.load %arg5[%c0_9, %c0_10, %c0_11] : memref<2x16x128xf32, #tpu.memory_space<vmem>>, vector<2x16x128xf32>
    tpu.vector_store %arg5[%c0_9, %c0_10, %c0_11], %17 {strides = array<i32>} : memref<2x16x128xf32, #tpu.memory_space<vmem>>, vector<2x16x128xf32>,
    return
  }
  func.func @transform_0(%arg0: i32) -> (i32, i32, i32) {
    %c0_i32 = arith.constant 0 : i32
    %c0_i32_0 = arith.constant 0 : i32
    %c0_i32_1 = arith.constant 0 : i32
    return %arg0, %c0_i32, %c0_i32_0 : i32, i32, i32
  }
  func.func @transform_1(%arg0: i32) -> (i32, i32) {
    %c0_i32 = arith.constant 0 : i32
    %c0_i32_0 = arith.constant 0 : i32
    %c0_i32_1 = arith.constant 0 : i32
    return %c0_i32, %c0_i32_0 : i32, i32
  }
  func.func @transform_2(%arg0: i32) -> (i32, i32) {
    %c0_i32 = arith.constant 0 : i32
    %c0_i32_0 = arith.constant 0 : i32
    %c0_i32_1 = arith.constant 0 : i32
    return %c0_i32, %c0_i32_0 : i32, i32
  }
  func.func @transform_3(%arg0: i32) -> (i32, i32) {
    %c0_i32 = arith.constant 0 : i32
    %c0_i32_0 = arith.constant 0 : i32
    %c0_i32_1 = arith.constant 0 : i32
    return %c0_i32, %c0_i32_0 : i32, i32
  }
  func.func @transform_4(%arg0: i32) -> (i32, i32, i32) {
    %c0_i32 = arith.constant 0 : i32
    %c0_i32_0 = arith.constant 0 : i32
    %c0_i32_1 = arith.constant 0 : i32
    return %arg0, %c0_i32, %c0_i32_0 : i32, i32, i32
  }
}

</mosaic_0001>

<bundles_post_ra>
// kernel: double_conv.3
= control target key start
LH: loop header
LB: loop body
LE: loop exit
PB: predicated region body
PF: predicated region fallthrough
CT: control target
= control target key end

     0   :  { %vm109_vm0 = vcmask 523264   ;;  %vm263_vm1 = vcmask 1046528   ;;  %vm308_vm2 = vcmask 1040384   ;;  %s571_s4 = inlined_call_operand.vmem [shape: bf16[3,64,128], index: 4, kind: input, shape index: {}]   ;;  %s572_s0 = inlined_call_operand.vmem [shape: f32[2,16,64], index: 0, kind: input, shape index: {}]   ;;  %s573_s1 = inlined_call_operand.vmem [shape: f32[1,64], index: 1, kind: input, shape index: {}, may-alias: {1,3}]   ;;  %s574_s2 = inlined_call_operand.vmem [shape: f32[1,64], index: 2, kind: input, shape index: {}]   ;;  %s575_s3 = inlined_call_operand.vmem [shape: f32[1,64], index: 3, kind: input, shape index: {}, may-alias: {1,3}]   ;;  %s576_s5 = inlined_call_operand.vmem [shape: f32[2,16,128], index: 5, kind: output, shape index: {0}]   ;;  %s577_s6 = inlined_call_operand.vmem [shape: f32[1,2,128], index: 6, kind: output, shape index: {1}]  }
   0x1   :  { %v396_v0 = vld [vmem:[%s571_s4 + $0x38] sm:$0xff]  ;;  %v395_v3 = vld [vmem:[%s571_s4 + $0x30] sm:$0xff]  ;;  %v23_v6 = vld [vmem:[%s572_s0] sm:$0xff] }
   0x2   :  { %v400_v1 = vld [vmem:[%s571_s4 + $0x58] sm:$0xff]  ;;  %172 = vmatpush.bf16.msra.mxu1 %v396_v0  ;;  %v399_v4 = vld [vmem:[%s571_s4 + $0x50] sm:$0xff]  ;;  %v24_v7 = vld [vmem:[%s572_s0 + $0x8] sm:$0xff] }
   0x3   :  { %v392_v2 = vld [vmem:[%s571_s4 + $0x18] sm:$0xff]  ;;  %224 = vmatpush.bf16.msra.mxu2 %v400_v1  ;;  %v391_v5 = vld [vmem:[%s571_s4 + $0x10] sm:$0xff]  ;;  %v405_v8 = vld [vmem:[%s573_s1] ss:$0 sm:$0xff] }
   0x4   :  { %120 = vmatpush.bf16.msra.mxu0 %v392_v2  ;;  %401 = vmatpush.bf16.msra.mxu3 %v392_v2  ;;  %v406_v9 = vld [vmem:[%s574_s2] ss:$0 sm:$0xff]  ;;  %v394_v10 = vld [vmem:[%s571_s4 + $0x28] sm:$0xff]  ;;  %v31_v12 = vmul.f32 %v405_v8, %v23_v6  ;;  %v32_v13 = vmul.f32 %v405_v8, %v24_v7  ;;  %v25_v14 = vld [vmem:[%s572_s0 + $0x10] sm:$0xff] }
   0x5   :  { %v398_v11 = vld [vmem:[%s571_s4 + $0x48] sm:$0xff]  ;;  %v26_v16 = vld [vmem:[%s572_s0 + $0x18] sm:$0xff]  ;;  %v33_v17 = vmul.f32 %v405_v8, %v25_v14  ;;  %v407_v20 = vld [vmem:[%s575_s3] ss:$0 sm:$0xff] }
   0x6   :  { %173 = vmatpush.bf16.msra.mxu1 %v395_v3  ;;  %v390_v15 = vld [vmem:[%s571_s4 + $0x8] sm:$0xff]  ;;  %v39_v18 = vadd.f32 %v406_v9, %v31_v12  ;;  %v40_v19 = vadd.f32 %v406_v9, %v32_v13  ;;  %v34_v21 = vmul.f32 %v405_v8, %v26_v16  ;;  %v393_v23 = vld [vmem:[%s571_s4 + $0x20] sm:$0xff] }
   0x7   :  { %225 = vmatpush.bf16.msra.mxu2 %v399_v4  ;;  %v41_v22 = vadd.f32 %v406_v9, %v33_v17  ;;  %v397_v24 = vld [vmem:[%s571_s4 + $0x40] sm:$0xff] }
   0x8   :  { %121 = vmatpush.bf16.msra.mxu0 %v391_v5  ;;  %402 = vmatpush.bf16.msra.mxu3 %v391_v5  ;;  %v43_v25 = vmax.f32 %v39_v18, 0.0  ;;  %v44_v26 = vmax.f32 %v40_v19, 0.0  ;;  %v48_v27 = vmin.f32 %v39_v18, 0.0  ;;  %v49_v28 = vmin.f32 %v40_v19, 0.0  ;;  %v389_v29 = vld [vmem:[%s571_s4] sm:$0xff] }
   0x9   :  { %v42_v30 = vadd.f32 %v406_v9, %v34_v21  ;;  %v45_v31 = vmax.f32 %v41_v22, 0.0  ;;  %v50_v32 = vmin.f32 %v41_v22, 0.0 }
   0xa   :  { %174 = vmatpush.bf16.msra.mxu1 %v394_v10  ;;  %v55_v33 = vmul.f32 %v407_v20, %v48_v27  ;;  %v56_v34 = vmul.f32 %v407_v20, %v49_v28 }
   0xb   :  { %226 = vmatpush.bf16.msra.mxu2 %v398_v11  ;;  %v46_v35 = vmax.f32 %v42_v30, 0.0  ;;  %v51_v36 = vmin.f32 %v42_v30, 0.0  ;;  %v57_v37 = vmul.f32 %v407_v20, %v50_v32 }
   0xc   :  { %122 = vmatpush.bf16.msra.mxu0 %v390_v15  ;;  %403 = vmatpush.bf16.msra.mxu3 %v390_v15  ;;  %v59_v38 = vadd.f32 %v55_v33, %v43_v25  ;;  %v60_v39 = vadd.f32 %v56_v34, %v44_v26 }
   0xd   :  { %v58_v40 = vmul.f32 %v407_v20, %v51_v36  ;;  %v61_v41 = vadd.f32 %v57_v37, %v45_v31 }
   0xe   :  { %175 = vmatpush.bf16.msra.mxu1 %v393_v23  ;;  %v63_v42 = vpack.c.bf16 %v59_v38, %v59_v38  ;;  %v64_v43 = vpack.c.bf16 %v60_v39, %v60_v39 }
   0xf   :  { %227 = vmatpush.bf16.msra.mxu2 %v397_v24  ;;  %v62_v44 = vadd.f32 %v58_v40, %v46_v35  ;;  %v65_v45 = vpack.c.bf16 %v61_v41, %v61_v41 }
  0x10   :  { %123 = vmatpush.bf16.msra.mxu0 %v389_v29  ;;  %404 = vmatpush.bf16.msra.mxu3 %v389_v29  ;;  %v79_v46 = vunpack.c.l.b16 %v63_v42  ;;  %v80_v47 = vunpack.c.l.b16 %v64_v43 }
  0x11   :  { %v66_v48 = vpack.c.bf16 %v62_v44, %v62_v44  ;;  %v81_v49 = vunpack.c.l.b16 %v65_v45 }
  0x12   :  { %v83_v50 = vpack.c.b16 %v80_v47, %v79_v46 }
  0x13   :  { %v82_v51 = vunpack.c.l.b16 %v66_v48 }
  0x14   :  { %361 = vmatmul.msk.bf16.vlgmr.msra.gmra.mxu1 %vm109_vm0, %v83_v50  ;;  %387 = vmatmul.msk.bf16.vlgmr.msra.gmra.mxu2 %vm109_vm0, %v83_v50 }
  0x15   :  { %335 = vmatmul.msk.bf16.vlgmr.msra.gmra.mxu0 %vm109_vm0, %v83_v50  ;;  %v84_v52 = vpack.c.b16 %v82_v51, %v81_v49 }
  0x17   :  { %336 = vmatmul.msk.bf16.vlgmr.msra.gmra.mxu3 %vm109_vm0, %v84_v52 }
  0x24   :  { %362 = vmatmul.msk.bf16.gmra.mxu1 %vm109_vm0, %v84_v52  ;;  %388 = vmatmul.msk.bf16.gmra.mxu2 %vm109_vm0, %v84_v52 }
  0x91   :  { %v177_v53 = vpop.f32.mrf.mxu1 }
  0x92   :  { %239 = vst [vmem:[%s576_s5] sm:$0xff] %v177_v53  ;;  %v125_v54 = vpop.f32.mrf.mxu0 }
  0x97   :  { %v229_v55 = vpop.f32.mrf.mxu2 }
  0x98   :  { %v264_v0 = vrot.slane %v229_v55, 1 }
  0x99   :  { %v179_v56 = vpop.f32.mrf.mxu1 }
  0x9a   :  { %240 = vst [vmem:[%s576_s5 + $0x8] sm:$0xff] %v179_v56  ;;  %v127_v57 = vpop.f32.mrf.mxu0  ;;  %v130_v2 = vpop.f32.mrf.mxu3 }
  0x9f   :  { %v231_v58 = vpop.f32.mrf.mxu2 }
  0xa0   :  { %v265_v1 = vrot.slane %v231_v58, 1 }
  0xa1   :  { %v243_v59 = vld [vmem:[%s576_s5 + $0x1] sm:$0xff]  ;;  %v244_v60 = vld [vmem:[%s576_s5 + $0x9] sm:$0x7f]  ;;  %v182_v61 = vpop.f32.mrf.mxu1 }
  0xa2   :  { %v247_v62 = vadd.f32 %v243_v59, %v125_v54  ;;  %v248_v63 = vadd.f32 %v244_v60, %v127_v57  ;;  %241 = vst [vmem:[%s576_s5 + $0x10] sm:$0xff] %v182_v61  ;;  %v266_v6 = vsel %vm263_vm1, %v264_v0, %v265_v1  ;;  %v132_v11 = vpop.f32.mrf.mxu3 }
  0xa4   :  { %251 = vst [vmem:[%s576_s5 + $0x1] sm:$0xff] %v247_v62 }
  0xa5   :  { %252 = vst [vmem:[%s576_s5 + $0x9] sm:$0x7f] %v248_v63 }
  0xa7   :  { %v234_v4 = vpop.f32.mrf.mxu2 }
  0xa8   :  { %v267_v16 = vrot.slane %v234_v4, 1 }
  0xa9   :  { %v184_v3 = vpop.f32.mrf.mxu1 }
  0xaa   :  { %242 = vst [vmem:[%s576_s5 + $0x18] sm:$0xff] %v184_v3 }
  0xab   :  { %v255_v5 = vld [vmem:[%s576_s5] sm:$0xff] }
  0xac   :  { %v274_v7 = vadd.f32 %v266_v6, %v255_v5  ;;  %v256_v8 = vld [vmem:[%s576_s5 + $0x8] sm:$0x7f] }
  0xad   :  { %v275_v9 = vadd.f32 %v265_v1, %v256_v8 }
  0xae   :  { %278 = vst [vmem:[%s576_s5] sm:$0xff] %v274_v7  ;;  %v295_v26 = vmul.f32 %v274_v7, %v274_v7 }
  0xaf   :  { %279 = vst [vmem:[%s576_s5 + $0x8] sm:$0x7f] %v275_v9  ;;  %v236_v15 = vpop.f32.mrf.mxu2 }
  0xb0   :  { %v268_v17 = vrot.slane %v236_v15, 1 }
  0xb1   :  { %v245_v10 = vld [vmem:[%s576_s5 + $0x11] sm:$0xff]  ;;  %v246_v12 = vld [vmem:[%s576_s5 + $0x19] sm:$0x7f] }
  0xb2   :  { %v249_v13 = vadd.f32 %v245_v10, %v130_v2  ;;  %v250_v14 = vadd.f32 %v246_v12, %v132_v11  ;;  %v269_v19 = vsel %vm263_vm1, %v267_v16, %v268_v17 }
  0xb4   :  { %253 = vst [vmem:[%s576_s5 + $0x11] sm:$0xff] %v249_v13 }
  0xb5   :  { %254 = vst [vmem:[%s576_s5 + $0x19] sm:$0x7f] %v250_v14 }
  0xb6   :  { %v283_v23 = vld [vmem:[%s576_s5 + $0x8] sm:$0xff] }
  0xb7   :  { %v296_v24 = vmul.f32 %v283_v23, %v283_v23  ;;  %v286_v25 = vadd.f32 %v283_v23, %v274_v7 }
  0xb9   :  { %v299_v28 = vadd.f32 %v296_v24, %v295_v26 }
  0xbb   :  { %v257_v18 = vld [vmem:[%s576_s5 + $0x10] sm:$0xff] }
  0xbc   :  { %v258_v20 = vld [vmem:[%s576_s5 + $0x18] sm:$0x7f]  ;;  %v276_v21 = vadd.f32 %v269_v19, %v257_v18 }
  0xbd   :  { %v277_v22 = vadd.f32 %v268_v17, %v258_v20 }
  0xbe   :  { %280 = vst [vmem:[%s576_s5 + $0x10] sm:$0xff] %v276_v21  ;;  %v297_v27 = vmul.f32 %v276_v21, %v276_v21  ;;  %v287_v29 = vadd.f32 %v286_v25, %v276_v21 }
  0xbf   :  { %281 = vst [vmem:[%s576_s5 + $0x18] sm:$0x7f] %v277_v22 }
  0xc0   :  { %v300_v33 = vadd.f32 %v299_v28, %v297_v27 }
  0xc6   :  { %v285_v30 = vld [vmem:[%s576_s5 + $0x18] sm:$0xff] }
  0xc7   :  { %v288_v31 = vadd.f32 %v287_v29, %v285_v30  ;;  %v298_v32 = vmul.f32 %v285_v30, %v285_v30 }
  0xc9   :  { %v289_v34 = vrot.slane %v288_v31, 4  ;;  %v301_v35 = vadd.f32 %v300_v33, %v298_v32 }
  0xcb   :  { %v290_v36 = vadd.f32 %v289_v34, %v288_v31  ;;  %v302_v37 = vrot.slane %v301_v35, 4 }
  0xcd   :  { %v291_v38 = vrot.slane %v290_v36, 2  ;;  %v303_v39 = vadd.f32 %v302_v37, %v301_v35 }
  0xcf   :  { %v292_v40 = vadd.f32 %v291_v38, %v290_v36  ;;  %v304_v41 = vrot.slane %v303_v39, 2 }
  0xd1   :  { %v293_v42 = vrot.slane %v292_v40, 1  ;;  %v305_v43 = vadd.f32 %v304_v41, %v303_v39 }
  0xd3   :  { %v306_v44 = vrot.slane %v305_v43, 1  ;;  %v294_v45 = vadd.f32 %v293_v42, %v292_v40 }
  0xd5   :  { %v307_v46 = vadd.f32 %v306_v44, %v305_v43 }
  0xd7   :  { %v309_v47 = vsel %vm308_vm2, %v294_v45, %v307_v46 }
  0xd8   :  { %310 = vst [vmem:[%s577_s6] sm:$0x3] %v309_v47 }

// kernel: double_conv.5
= control target key start
LH: loop header
LB: loop body
LE: loop exit
PB: predicated region body
PF: predicated region fallthrough
CT: control target
= control target key end

     0   :  { %s126_s0 = inlined_call_operand.vmem [shape: f32[2,16,128], index: 0, kind: input, shape index: {}]   ;;  %s127_s1 = inlined_call_operand.vmem [shape: f32[1,128], index: 1, kind: input, shape index: {}]   ;;  %s128_s2 = inlined_call_operand.vmem [shape: f32[1,128], index: 2, kind: input, shape index: {}]   ;;  %s129_s3 = inlined_call_operand.vmem [shape: f32[1,128], index: 3, kind: input, shape index: {}]   ;;  %s130_s4 = inlined_call_operand.vmem [shape: f32[2,16,128], index: 4, kind: output, shape index: {}]  }
   0x1   :  { %v17_v0 = vld [vmem:[%s126_s0] sm:$0xff]  ;;  %v18_v4 = vld [vmem:[%s126_s0 + $0x8] sm:$0xff]  ;;  %v19_v5 = vld [vmem:[%s126_s0 + $0x10] sm:$0xff] }
   0x2   :  { %v65_v1 = vld [vmem:[%s127_s1] ss:$0 sm:$0xff]  ;;  %v20_v8 = vld [vmem:[%s126_s0 + $0x18] sm:$0xff] }
   0x3   :  { %v66_v2 = vld [vmem:[%s128_s2] ss:$0 sm:$0xff]  ;;  %v25_v3 = vmul.f32 %v65_v1, %v17_v0  ;;  %v26_v6 = vmul.f32 %v65_v1, %v18_v4  ;;  %v27_v7 = vmul.f32 %v65_v1, %v19_v5  ;;  %v28_v11 = vmul.f32 %v65_v1, %v20_v8 }
   0x4   :  { %v67_v10 = vld [vmem:[%s129_s3] ss:$0 sm:$0xff] }
   0x5   :  { %v33_v9 = vadd.f32 %v66_v2, %v25_v3  ;;  %v34_v12 = vadd.f32 %v66_v2, %v26_v6  ;;  %v35_v13 = vadd.f32 %v66_v2, %v27_v7  ;;  %v36_v16 = vadd.f32 %v66_v2, %v28_v11 }
   0x7   :  { %v37_v14 = vmax.f32 %v33_v9, 0.0  ;;  %v42_v15 = vmin.f32 %v33_v9, 0.0  ;;  %v38_v17 = vmax.f32 %v34_v12, 0.0  ;;  %v43_v18 = vmin.f32 %v34_v12, 0.0 }
   0x8   :  { %v39_v19 = vmax.f32 %v35_v13, 0.0  ;;  %v44_v20 = vmin.f32 %v35_v13, 0.0  ;;  %v40_v22 = vmax.f32 %v36_v16, 0.0  ;;  %v45_v23 = vmin.f32 %v36_v16, 0.0 }
   0x9   :  { %v49_v21 = vmul.f32 %v67_v10, %v42_v15  ;;  %v50_v24 = vmul.f32 %v67_v10, %v43_v18 }
   0xa   :  { %v51_v25 = vmul.f32 %v67_v10, %v44_v20  ;;  %v52_v27 = vmul.f32 %v67_v10, %v45_v23 }
   0xb   :  { %v53_v26 = vadd.f32 %v49_v21, %v37_v14  ;;  %v54_v28 = vadd.f32 %v50_v24, %v38_v17 }
   0xc   :  { %v55_v29 = vadd.f32 %v51_v25, %v39_v19  ;;  %v56_v30 = vadd.f32 %v52_v27, %v40_v22 }
   0xd   :  { %57 = vst [vmem:[%s130_s4] sm:$0xff] %v53_v26 }
   0xe   :  { %58 = vst [vmem:[%s130_s4 + $0x8] sm:$0xff] %v54_v28 }
   0xf   :  { %59 = vst [vmem:[%s130_s4 + $0x10] sm:$0xff] %v55_v29 }
  0x10   :  { %60 = vst [vmem:[%s130_s4 + $0x18] sm:$0xff] %v56_v30 }

// kernel: double_conv.4
= control target key start
LH: loop header
LB: loop body
LE: loop exit
PB: predicated region body
PF: predicated region fallthrough
CT: control target
= control target key end

     0   :  { %vm353_vm0 = vcmask 1046528   ;;  %vm398_vm1 = vcmask 1040384   ;;  %s771_s4 = inlined_call_operand.vmem [shape: bf16[3,128,128], index: 4, kind: input, shape index: {}]   ;;  %s772_s0 = inlined_call_operand.vmem [shape: f32[2,16,128], index: 0, kind: input, shape index: {}]   ;;  %s773_s1 = inlined_call_operand.vmem [shape: f32[1,128], index: 1, kind: input, shape index: {}]   ;;  %s774_s2 = inlined_call_operand.vmem [shape: f32[1,128], index: 2, kind: input, shape index: {}]   ;;  %s775_s3 = inlined_call_operand.vmem [shape: f32[1,128], index: 3, kind: input, shape index: {}]   ;;  %s776_s5 = inlined_call_operand.vmem [shape: f32[2,16,128], index: 5, kind: output, shape index: {0}]   ;;  %s777_s6 = inlined_call_operand.vmem [shape: f32[1,2,128], index: 6, kind: output, shape index: {1}]  }
   0x1   :  { %v552_v0 = vld [vmem:[%s771_s4 + $0x78] sm:$0xff]  ;;  %v551_v3 = vld [vmem:[%s771_s4 + $0x70] sm:$0xff]  ;;  %v550_v6 = vld [vmem:[%s771_s4 + $0x68] sm:$0xff] }
   0x2   :  { %v560_v1 = vld [vmem:[%s771_s4 + $0xb8] sm:$0xff]  ;;  %226 = vmatpush.bf16.msra.mxu1 %v552_v0  ;;  %v559_v4 = vld [vmem:[%s771_s4 + $0xb0] sm:$0xff]  ;;  %v558_v7 = vld [vmem:[%s771_s4 + $0xa8] sm:$0xff] }
   0x3   :  { %v544_v2 = vld [vmem:[%s771_s4 + $0x38] sm:$0xff]  ;;  %310 = vmatpush.bf16.msra.mxu2 %v560_v1  ;;  %v543_v5 = vld [vmem:[%s771_s4 + $0x30] sm:$0xff]  ;;  %v542_v8 = vld [vmem:[%s771_s4 + $0x28] sm:$0xff] }
   0x4   :  { %142 = vmatpush.bf16.msra.mxu0 %v544_v2  ;;  %561 = vmatpush.bf16.msra.mxu3 %v544_v2  ;;  %v22_v9 = vld [vmem:[%s772_s0] sm:$0xff]  ;;  %v23_v10 = vld [vmem:[%s772_s0 + $0x8] sm:$0xff]  ;;  %v24_v17 = vld [vmem:[%s772_s0 + $0x10] sm:$0xff] }
   0x5   :  { %v569_v11 = vld [vmem:[%s773_s1] ss:$0 sm:$0xff]  ;;  %v25_v19 = vld [vmem:[%s772_s0 + $0x18] sm:$0xff]  ;;  %v547_v41 = vld [vmem:[%s771_s4 + $0x50] sm:$0xff] }
   0x6   :  { %227 = vmatpush.bf16.msra.mxu1 %v551_v3  ;;  %v570_v12 = vld [vmem:[%s774_s2] ss:$0 sm:$0xff]  ;;  %v30_v15 = vmul.f32 %v569_v11, %v22_v9  ;;  %v31_v16 = vmul.f32 %v569_v11, %v23_v10  ;;  %v32_v20 = vmul.f32 %v569_v11, %v24_v17  ;;  %v33_v24 = vmul.f32 %v569_v11, %v25_v19  ;;  %v548_v26 = vld [vmem:[%s771_s4 + $0x58] sm:$0xff]  ;;  %v555_v42 = vld [vmem:[%s771_s4 + $0x90] sm:$0xff] }
   0x7   :  { %311 = vmatpush.bf16.msra.mxu2 %v559_v4  ;;  %v549_v13 = vld [vmem:[%s771_s4 + $0x60] sm:$0xff]  ;;  %v556_v27 = vld [vmem:[%s771_s4 + $0x98] sm:$0xff]  ;;  %v539_v45 = vld [vmem:[%s771_s4 + $0x10] sm:$0xff] }
   0x8   :  { %143 = vmatpush.bf16.msra.mxu0 %v543_v5  ;;  %562 = vmatpush.bf16.msra.mxu3 %v543_v5  ;;  %v557_v14 = vld [vmem:[%s771_s4 + $0xa0] sm:$0xff]  ;;  %v38_v21 = vadd.f32 %v570_v12, %v30_v15  ;;  %v39_v22 = vadd.f32 %v570_v12, %v31_v16  ;;  %v40_v25 = vadd.f32 %v570_v12, %v32_v20  ;;  %v540_v32 = vld [vmem:[%s771_s4 + $0x18] sm:$0xff]  ;;  %v546_v51 = vld [vmem:[%s771_s4 + $0x48] sm:$0xff] }
   0x9   :  { %v541_v18 = vld [vmem:[%s771_s4 + $0x20] sm:$0xff]  ;;  %v41_v33 = vadd.f32 %v570_v12, %v33_v24  ;;  %v554_v52 = vld [vmem:[%s771_s4 + $0x88] sm:$0xff] }
   0xa   :  { %228 = vmatpush.bf16.msra.mxu1 %v550_v6  ;;  %v571_v23 = vld [vmem:[%s775_s3] ss:$0 sm:$0xff]  ;;  %v42_v28 = vmax.f32 %v38_v21, 0.0  ;;  %v43_v29 = vmax.f32 %v39_v22, 0.0  ;;  %v47_v30 = vmin.f32 %v38_v21, 0.0  ;;  %v48_v31 = vmin.f32 %v39_v22, 0.0 }
   0xb   :  { %312 = vmatpush.bf16.msra.mxu2 %v558_v7  ;;  %v44_v34 = vmax.f32 %v40_v25, 0.0  ;;  %v49_v35 = vmin.f32 %v40_v25, 0.0  ;;  %v45_v38 = vmax.f32 %v41_v33, 0.0  ;;  %v50_v39 = vmin.f32 %v41_v33, 0.0  ;;  %v538_v54 = vld [vmem:[%s771_s4 + $0x8] sm:$0xff]  ;;  %v545_v58 = vld [vmem:[%s771_s4 + $0x40] sm:$0xff] }
   0xc   :  { %144 = vmatpush.bf16.msra.mxu0 %v542_v8  ;;  %563 = vmatpush.bf16.msra.mxu3 %v542_v8  ;;  %v54_v36 = vmul.f32 %v571_v23, %v47_v30  ;;  %v55_v37 = vmul.f32 %v571_v23, %v48_v31  ;;  %v553_v59 = vld [vmem:[%s771_s4 + $0x80] sm:$0xff] }
   0xd   :  { %v56_v40 = vmul.f32 %v571_v23, %v49_v35  ;;  %v57_v46 = vmul.f32 %v571_v23, %v50_v39  ;;  %v537_v62 = vld [vmem:[%s771_s4] sm:$0xff] }
   0xe   :  { %229 = vmatpush.bf16.msra.mxu1 %v549_v13  ;;  %v58_v43 = vadd.f32 %v54_v36, %v42_v28  ;;  %v59_v44 = vadd.f32 %v55_v37, %v43_v29 }
   0xf   :  { %313 = vmatpush.bf16.msra.mxu2 %v557_v14  ;;  %v60_v47 = vadd.f32 %v56_v40, %v44_v34  ;;  %v61_v50 = vadd.f32 %v57_v46, %v45_v38 }
  0x10   :  { %145 = vmatpush.bf16.msra.mxu0 %v541_v18  ;;  %564 = vmatpush.bf16.msra.mxu3 %v541_v18  ;;  %v62_v48 = vpack.c.bf16 %v58_v43, %v58_v43  ;;  %v63_v49 = vpack.c.bf16 %v59_v44, %v59_v44 }
  0x11   :  { %v64_v53 = vpack.c.bf16 %v60_v47, %v60_v47  ;;  %v65_v55 = vpack.c.bf16 %v61_v50, %v61_v50 }
  0x12   :  { %230 = vmatpush.bf16.msra.mxu1 %v548_v26  ;;  %v86_v56 = vunpack.c.l.b16 %v62_v48  ;;  %v87_v57 = vunpack.c.l.b16 %v63_v49 }
  0x13   :  { %314 = vmatpush.bf16.msra.mxu2 %v556_v27  ;;  %v88_v60 = vunpack.c.l.b16 %v64_v53  ;;  %v89_v61 = vunpack.c.l.b16 %v65_v55 }
  0x14   :  { %146 = vmatpush.bf16.msra.mxu0 %v540_v32  ;;  %565 = vmatpush.bf16.msra.mxu3 %v540_v32  ;;  %v90_v63 = vpack.c.b16 %v87_v57, %v86_v56 }
  0x15   :  { %v91_v0 = vpack.c.b16 %v89_v61, %v88_v60 }
  0x16   :  { %231 = vmatpush.bf16.msra.mxu1 %v547_v41 }
  0x17   :  { %315 = vmatpush.bf16.msra.mxu2 %v555_v42 }
  0x18   :  { %147 = vmatpush.bf16.msra.mxu0 %v539_v45  ;;  %566 = vmatpush.bf16.msra.mxu3 %v539_v45 }
  0x1a   :  { %232 = vmatpush.bf16.msra.mxu1 %v546_v51 }
  0x1b   :  { %316 = vmatpush.bf16.msra.mxu2 %v554_v52 }
  0x1c   :  { %148 = vmatpush.bf16.msra.mxu0 %v538_v54  ;;  %567 = vmatpush.bf16.msra.mxu3 %v538_v54 }
  0x1e   :  { %233 = vmatpush.bf16.msra.mxu1 %v545_v58 }
  0x1f   :  { %317 = vmatpush.bf16.msra.mxu2 %v553_v59 }
  0x20   :  { %149 = vmatpush.bf16.msra.mxu0 %v537_v62  ;;  %568 = vmatpush.bf16.msra.mxu3 %v537_v62 }
  0x21   :  { %234 = vmatmul.bf16.vlgmr.msra.gmra.mxu1 %v90_v63 }
  0x22   :  { %318 = vmatmul.bf16.vlgmr.msra.gmra.mxu2 %v90_v63 }
  0x23   :  { %150 = vmatmul.bf16.vlgmr.msra.gmra.mxu0 %v90_v63  ;;  %155 = vmatmul.bf16.vlgmr.msra.gmra.mxu3 %v91_v0 }
  0x31   :  { %239 = vmatmul.bf16.gmra.mxu1 %v91_v0 }
  0x32   :  { %323 = vmatmul.bf16.gmra.mxu2 %v91_v0 }
  0x9e   :  { %v235_v1 = vpop.f32.mrf.mxu1 }
  0x9f   :  { %329 = vst [vmem:[%s776_s5] sm:$0xff] %v235_v1 }
  0xa0   :  { %v151_v2 = vpop.f32.mrf.mxu0 }
  0xa5   :  { %v319_v3 = vpop.f32.mrf.mxu2 }
  0xa6   :  { %v237_v4 = vpop.f32.mrf.mxu1  ;;  %v354_v12 = vrot.slane %v319_v3, 1  ;;  %v156_v14 = vpop.f32.mrf.mxu3 }
  0xa7   :  { %330 = vst [vmem:[%s776_s5 + $0x8] sm:$0xff] %v237_v4 }
  0xa8   :  { %v153_v5 = vpop.f32.mrf.mxu0 }
  0xad   :  { %v321_v6 = vpop.f32.mrf.mxu2 }
  0xae   :  { %v333_v7 = vld [vmem:[%s776_s5 + $0x1] sm:$0xff]  ;;  %v334_v8 = vld [vmem:[%s776_s5 + $0x9] sm:$0x7f]  ;;  %v240_v9 = vpop.f32.mrf.mxu1  ;;  %v355_v13 = vrot.slane %v321_v6, 1  ;;  %v158_v23 = vpop.f32.mrf.mxu3 }
  0xaf   :  { %v337_v10 = vadd.f32 %v333_v7, %v151_v2  ;;  %v338_v11 = vadd.f32 %v334_v8, %v153_v5  ;;  %331 = vst [vmem:[%s776_s5 + $0x10] sm:$0xff] %v240_v9 }
  0xb0   :  { %v356_v18 = vsel %vm353_vm0, %v354_v12, %v355_v13 }
  0xb1   :  { %341 = vst [vmem:[%s776_s5 + $0x1] sm:$0xff] %v337_v10 }
  0xb2   :  { %342 = vst [vmem:[%s776_s5 + $0x9] sm:$0x7f] %v338_v11 }
  0xb5   :  { %v324_v16 = vpop.f32.mrf.mxu2 }
  0xb6   :  { %v242_v15 = vpop.f32.mrf.mxu1  ;;  %v357_v28 = vrot.slane %v324_v16, 1 }
  0xb7   :  { %332 = vst [vmem:[%s776_s5 + $0x18] sm:$0xff] %v242_v15 }
  0xb8   :  { %v345_v17 = vld [vmem:[%s776_s5] sm:$0xff] }
  0xb9   :  { %v364_v19 = vadd.f32 %v356_v18, %v345_v17  ;;  %v346_v20 = vld [vmem:[%s776_s5 + $0x8] sm:$0x7f] }
  0xba   :  { %v365_v21 = vadd.f32 %v355_v13, %v346_v20 }
  0xbb   :  { %368 = vst [vmem:[%s776_s5] sm:$0xff] %v364_v19  ;;  %v385_v38 = vmul.f32 %v364_v19, %v364_v19 }
  0xbc   :  { %369 = vst [vmem:[%s776_s5 + $0x8] sm:$0x7f] %v365_v21 }
  0xbd   :  { %v326_v27 = vpop.f32.mrf.mxu2 }
  0xbe   :  { %v335_v22 = vld [vmem:[%s776_s5 + $0x11] sm:$0xff]  ;;  %v336_v24 = vld [vmem:[%s776_s5 + $0x19] sm:$0x7f]  ;;  %v358_v29 = vrot.slane %v326_v27, 1 }
  0xbf   :  { %v339_v25 = vadd.f32 %v335_v22, %v156_v14  ;;  %v340_v26 = vadd.f32 %v336_v24, %v158_v23 }
  0xc0   :  { %v359_v31 = vsel %vm353_vm0, %v357_v28, %v358_v29 }
  0xc1   :  { %343 = vst [vmem:[%s776_s5 + $0x11] sm:$0xff] %v339_v25 }
  0xc2   :  { %344 = vst [vmem:[%s776_s5 + $0x19] sm:$0x7f] %v340_v26 }
  0xc3   :  { %v373_v35 = vld [vmem:[%s776_s5 + $0x8] sm:$0xff] }
  0xc4   :  { %v386_v36 = vmul.f32 %v373_v35, %v373_v35  ;;  %v376_v37 = vadd.f32 %v373_v35, %v364_v19 }
  0xc6   :  { %v389_v40 = vadd.f32 %v386_v36, %v385_v38 }
  0xc8   :  { %v347_v30 = vld [vmem:[%s776_s5 + $0x10] sm:$0xff] }
  0xc9   :  { %v348_v32 = vld [vmem:[%s776_s5 + $0x18] sm:$0x7f]  ;;  %v366_v33 = vadd.f32 %v359_v31, %v347_v30 }
  0xca   :  { %v367_v34 = vadd.f32 %v358_v29, %v348_v32 }
  0xcb   :  { %370 = vst [vmem:[%s776_s5 + $0x10] sm:$0xff] %v366_v33  ;;  %v387_v39 = vmul.f32 %v366_v33, %v366_v33  ;;  %v377_v41 = vadd.f32 %v376_v37, %v366_v33 }
  0xcc   :  { %371 = vst [vmem:[%s776_s5 + $0x18] sm:$0x7f] %v367_v34 }
  0xcd   :  { %v390_v45 = vadd.f32 %v389_v40, %v387_v39 }
  0xd3   :  { %v375_v42 = vld [vmem:[%s776_s5 + $0x18] sm:$0xff] }
  0xd4   :  { %v378_v43 = vadd.f32 %v377_v41, %v375_v42  ;;  %v388_v44 = vmul.f32 %v375_v42, %v375_v42 }
  0xd6   :  { %v379_v46 = vrot.slane %v378_v43, 4  ;;  %v391_v47 = vadd.f32 %v390_v45, %v388_v44 }
  0xd8   :  { %v380_v48 = vadd.f32 %v379_v46, %v378_v43  ;;  %v392_v49 = vrot.slane %v391_v47, 4 }
  0xda   :  { %v381_v50 = vrot.slane %v380_v48, 2  ;;  %v393_v51 = vadd.f32 %v392_v49, %v391_v47 }
  0xdc   :  { %v382_v52 = vadd.f32 %v381_v50, %v380_v48  ;;  %v394_v53 = vrot.slane %v393_v51, 2 }
  0xde   :  { %v383_v54 = vrot.slane %v382_v52, 1  ;;  %v395_v55 = vadd.f32 %v394_v53, %v393_v51 }
  0xe0   :  { %v396_v56 = vrot.slane %v395_v55, 1  ;;  %v384_v57 = vadd.f32 %v383_v54, %v382_v52 }
  0xe2   :  { %v397_v58 = vadd.f32 %v396_v56, %v395_v55 }
  0xe4   :  { %v399_v59 = vsel %vm398_vm1, %v384_v57, %v397_v58 }
  0xe5   :  { %400 = vst [vmem:[%s777_s6] sm:$0x3] %v399_v59 }

</bundles_post_ra>
